<compile_context>
chip_gen: v7x
topology: tpu7x:2x2x1
jax: 0.10.0
libtpu: 0.0.40
codegen_flags: <defaults>
</compile_context>

<pallas_src>
import math
import functools

import jax
import jax.numpy as jnp
from jax.experimental import pallas as pl
from jax.experimental.pallas import tpu as pltpu

_LANES = 128  # lane width for the per-block partial-sum output (unmasked vst)


def _smooth_top1_svm_kernel(x_ref, y_ref, out_ref, *, tau, alpha, thresh, n_total, tile_n):
    # x_ref: (TN, C) logits (native dtype) ; y_ref: (TN, 1) i32 labels
    # out_ref: (1, 128) f32 -> per-block partial sum broadcast across lanes
    i = pl.program_id(0)
    x = x_ref[...].astype(jnp.float32)                        # (TN, C) f32
    y = y_ref[...]                                            # (TN, 1) i32
    tn, c = x.shape

    class_ids = jax.lax.broadcasted_iota(jnp.int32, (tn, c), 1)
    onehot = class_ids == y                                   # (TN, C) bool

    # ground-truth score x_y = x.gather(1, y)
    x_y = jnp.sum(jnp.where(onehot, x, 0.0), axis=1, keepdims=True)           # (TN, 1)

    # ---- detect_large(x, k=1, tau, thresh): top-1 vs top-2 gap test ----
    top1 = jnp.max(x, axis=1, keepdims=True)                                  # (TN, 1)
    # mask exactly the first occurrence of the max -> duplicate-aware 2nd value
    first_max = jnp.min(jnp.where(x == top1, class_ids, c), axis=1, keepdims=True)
    top2 = jnp.max(jnp.where(class_ids == first_max, -jnp.inf, x), axis=1, keepdims=True)
    hard = (top1 - top2) >= jnp.float32(tau * math.log(thresh))               # (TN, 1)

    # ---- margin-augmented scores: x + alpha * 1[j != y] ----
    aug = jnp.where(onehot, x, x + jnp.float32(alpha))                        # (TN, C)
    max_aug = jnp.max(aug, axis=1, keepdims=True)                             # (TN, 1)

    # hard loss per sample
    loss_h = max_aug - x_y                                                    # (TN, 1)

    # smooth loss per sample, rewritten as loss_h + tau*log(sum exp((aug - max_aug)/tau)).
    # (S >= 1 always, since the max term contributes exp(0) = 1 -> log is safe.)
    s = jnp.sum(jnp.exp((aug - max_aug) * jnp.float32(1.0 / tau)),
                axis=1, keepdims=True)                                        # (TN, 1)
    per_sample = loss_h + jnp.where(hard, 0.0, jnp.float32(tau) * jnp.log(s))  # (TN, 1)

    # mask padded rows of the ragged last tile (divide by the GLOBAL N in the wrapper)
    row_ids = i * tile_n + jax.lax.broadcasted_iota(jnp.int32, (tn, 1), 0)
    per_sample = jnp.where(row_ids < n_total, per_sample, 0.0)

    partial = jnp.sum(per_sample)
    out_ref[...] = jnp.full((1, _LANES), partial, dtype=jnp.float32)


def _round_up(v, m):
    return (v + m - 1) // m * m


def smooth_top1_svm(x, y, *, n_classes, tau=1.0, alpha=None, thresh=1000.0,
                    tile_n=None, vmem_budget_bytes=12 << 20):
    """x: (N, C) float logits (any float dtype), y: (N,) int labels. Returns scalar f32 loss."""
    alpha = 1.0 if alpha is None else float(alpha)
    n, c = x.shape
    assert c == n_classes
    y2 = y.astype(jnp.int32).reshape(n, 1)

    if tile_n is None:
        # Size the batch tile conservatively so the double-buffered input tile plus ~5 f32
        # (TN, C) temporaries stay within a budget that fits the default scoped VMEM on
        # v5e (16 MiB) and leaves plenty of headroom on v7x (64 MiB physical).
        itemsize = jnp.dtype(x.dtype).itemsize
        per_row = c * (2 * itemsize + 5 * 4)
        tile_n = max(8, min(1024, (vmem_budget_bytes // max(per_row, 1)) // 8 * 8))
    tile_n = int(min(tile_n, _round_up(n, 8)))
    num_blocks = pl.cdiv(n, tile_n)

    kernel = functools.partial(
        _smooth_top1_svm_kernel,
        tau=float(tau), alpha=alpha, thresh=float(thresh),
        n_total=n, tile_n=tile_n,
    )
    partials = pl.pallas_call(
        kernel,
        out_shape=jax.ShapeDtypeStruct((1, num_blocks * _LANES), jnp.float32),
        grid=(num_blocks,),
        in_specs=[
            pl.BlockSpec((tile_n, c), lambda i: (i, 0)),   # logits tile (native dtype)
            pl.BlockSpec((tile_n, 1), lambda i: (i, 0)),   # labels tile (i32 column)
        ],
        out_specs=pl.BlockSpec((1, _LANES), lambda i: (0, i)),   # lane-dense partial sums
        compiler_params=pltpu.CompilerParams(
            dimension_semantics=("parallel",),             # megacore sharding on v7x
            vmem_limit_bytes=32 * 1024 * 1024,
        ),
    )(x, y2)

    # final reduction + global /N on the host-side JAX graph (tiny)
    partials = partials.reshape(num_blocks, _LANES)[:, 0]
    return jnp.sum(partials) / jnp.float32(n)


def _reference_loss(x, y, *, tau=1.0, alpha=1.0, thresh=1000.0):
    # Pure-JAX transcription of the PyTorch forward for verification.
    n, c = x.shape
    x = x.astype(jnp.float32)
    top2 = jax.lax.top_k(x, 2)[0]
    hard = (top2[:, 0] - top2[:, 1]) >= tau * math.log(thresh)
    onehot = jax.nn.one_hot(y, c, dtype=x.dtype)
    x_y = jnp.sum(x * onehot, axis=1)
    aug = x + alpha * (1.0 - onehot)
    loss_h = jnp.max(aug, axis=1) - x_y
    loss_s = tau * jax.scipy.special.logsumexp((aug - x_y[:, None]) / tau, axis=1)
    per = jnp.where(hard, loss_h, loss_s)
    return jnp.sum(per) / n


if __name__ == "__main__":
    n_classes = 16
    batch = 20          # not a multiple of the tile -> exercises ragged-tile masking
    tau, alpha, thresh = 1.0, 1.0, 1000.0

    key = jax.random.PRNGKey(0)
    kx, ky = jax.random.split(key)
    x = jax.random.normal(kx, (batch, n_classes), dtype=jnp.float32)
    # scale a couple of rows so both smooth and hard branches are exercised
    scale = jnp.where(jnp.arange(batch)[:, None] < 2, 20.0, 1.0)
    x = x * scale
    y = jax.random.randint(ky, (batch,), 0, n_classes, dtype=jnp.int32)

    # force a multi-block grid (3 tiles of 8 rows, last one ragged) to exercise the pipeline
    loss = smooth_top1_svm(x, y, n_classes=n_classes, tau=tau, alpha=alpha,
                           thresh=thresh, tile_n=8)
    loss = jax.block_until_ready(loss)

    ref = _reference_loss(x, y, tau=tau, alpha=alpha, thresh=thresh)
    assert jnp.allclose(loss, ref, rtol=1e-4, atol=1e-4), (loss, ref)

    print("KERNEL_OK")
</pallas_src>

<mosaic_0001>
module attributes {stable_mosaic.version = 11 : i64} {
  func.func @_smooth_top1_svm_kernel(%arg0: i32, %arg1: memref<8x16xf32, #tpu.memory_space<vmem>>, %arg2: memref<8x1xi32, #tpu.memory_space<vmem>>, %arg3: memref<1x128xf32, #tpu.memory_space<vmem>>) attributes {dimension_semantics = [#tpu.dimension_semantics<parallel>], iteration_bounds = array<i64: 3>, scalar_prefetch = 0 : i64, scratch_operands = 0 : i64, tpu.core_type = #tpu.core_type<tc>, window_params = [{transform_indices = @transform_0, window_bounds = array<i64: 8, 16>}, {transform_indices = @transform_1, window_bounds = array<i64: 8, 1>}, {transform_indices = @transform_2, window_bounds = array<i64: 1, 128>}]} {
    %c0 = arith.constant 0 : index
    %c0_0 = arith.constant 0 : index
    %0 = vector.load %arg1[%c0, %c0_0] : memref<8x16xf32, #tpu.memory_space<vmem>>, vector<8x16xf32>
    %c0_1 = arith.constant 0 : index
    %c0_2 = arith.constant 0 : index
    %1 = vector.load %arg2[%c0_1, %c0_2] : memref<8x1xi32, #tpu.memory_space<vmem>>, vector<8x1xi32>
    %2 = tpu.iota {dimensions = array<i32: 1>} : vector<8x16xi32>
    %3 = vector.broadcast %1 : vector<8x1xi32> to vector<8x16xi32>
    %4 = arith.cmpi eq, %2, %3 : vector<8x16xi32>
    %cst = arith.constant 0.000000e+00 : f32
    %5 = vector.broadcast %cst : f32 to vector<8x16xf32>
    %6 = arith.select %4, %0, %5 : vector<8x16xi1>, vector<8x16xf32>
    %cst_3 = arith.constant dense<0.000000e+00> : vector<8xf32>
    %7 = vector.multi_reduction <add>, %6, %cst_3 [1] : vector<8x16xf32> to vector<8xf32>
    %8 = vector.shape_cast %7 : vector<8xf32> to vector<8x1xf32>
    %cst_4 = arith.constant dense<0xFF800000> : vector<8xf32>
    %9 = vector.multi_reduction <maximumf>, %0, %cst_4 [1] : vector<8x16xf32> to vector<8xf32>
    %10 = vector.shape_cast %9 : vector<8xf32> to vector<8x1xf32>
    %11 = vector.broadcast %10 : vector<8x1xf32> to vector<8x16xf32>
    %12 = arith.cmpf oeq, %0, %11 : vector<8x16xf32>
    %c16_i32 = arith.constant 16 : i32
    %13 = vector.broadcast %c16_i32 : i32 to vector<8x16xi32>
    %14 = arith.select %12, %2, %13 : vector<8x16xi1>, vector<8x16xi32>
    %cst_5 = arith.constant dense<2147483647> : vector<8xi32>
    %15 = vector.multi_reduction <minsi>, %14, %cst_5 [1] : vector<8x16xi32> to vector<8xi32>
    %16 = vector.shape_cast %15 : vector<8xi32> to vector<8x1xi32>
    %17 = vector.broadcast %16 : vector<8x1xi32> to vector<8x16xi32>
    %18 = arith.cmpi eq, %2, %17 : vector<8x16xi32>
    %cst_6 = arith.constant 0xFF800000 : f32
    %19 = vector.broadcast %cst_6 : f32 to vector<8x16xf32>
    %20 = arith.select %18, %19, %0 : vector<8x16xi1>, vector<8x16xf32>
    %cst_7 = arith.constant dense<0xFF800000> : vector<8xf32>
    %21 = vector.multi_reduction <maximumf>, %20, %cst_7 [1] : vector<8x16xf32> to vector<8xf32>
    %22 = vector.shape_cast %21 : vector<8xf32> to vector<8x1xf32>
    %23 = arith.subf %10, %22 : vector<8x1xf32>
    %cst_8 = arith.constant 6.90775537 : f32
    %24 = vector.broadcast %cst_8 : f32 to vector<8x1xf32>
    %25 = arith.cmpf oge, %23, %24 : vector<8x1xf32>
    %cst_9 = arith.constant 1.000000e+00 : f32
    %26 = vector.broadcast %cst_9 : f32 to vector<8x16xf32>
    %27 = arith.addf %0, %26 : vector<8x16xf32>
    %28 = arith.select %4, %0, %27 : vector<8x16xi1>, vector<8x16xf32>
    %cst_10 = arith.constant dense<0xFF800000> : vector<8xf32>
    %29 = vector.multi_reduction <maximumf>, %28, %cst_10 [1] : vector<8x16xf32> to vector<8xf32>
    %30 = vector.shape_cast %29 : vector<8xf32> to vector<8x1xf32>
    %31 = arith.subf %30, %8 : vector<8x1xf32>
    %32 = vector.broadcast %30 : vector<8x1xf32> to vector<8x16xf32>
    %33 = arith.subf %28, %32 : vector<8x16xf32>
    %cst_11 = arith.constant 1.000000e+00 : f32
    %34 = vector.broadcast %cst_11 : f32 to vector<8x16xf32>
    %35 = arith.mulf %33, %34 : vector<8x16xf32>
    %36 = math.exp %35 : vector<8x16xf32>
    %cst_12 = arith.constant dense<0.000000e+00> : vector<8xf32>
    %37 = vector.multi_reduction <add>, %36, %cst_12 [1] : vector<8x16xf32> to vector<8xf32>
    %38 = vector.shape_cast %37 : vector<8xf32> to vector<8x1xf32>
    %39 = math.log %38 : vector<8x1xf32>
    %cst_13 = arith.constant 1.000000e+00 : f32
    %40 = vector.broadcast %cst_13 : f32 to vector<8x1xf32>
    %41 = arith.mulf %40, %39 : vector<8x1xf32>
    %cst_14 = arith.constant 0.000000e+00 : f32
    %42 = vector.broadcast %cst_14 : f32 to vector<8x1xf32>
    %43 = arith.select %25, %42, %41 : vector<8x1xi1>, vector<8x1xf32>
    %44 = arith.addf %31, %43 : vector<8x1xf32>
    %c8_i32 = arith.constant 8 : i32
    %45 = arith.muli %arg0, %c8_i32 : i32
    %46 = tpu.iota {dimensions = array<i32: 0>} : vector<8x1xi32>
    %47 = vector.broadcast %45 : i32 to vector<8x1xi32>
    %48 = arith.addi %47, %46 : vector<8x1xi32>
    %c20_i32 = arith.constant 20 : i32
    %49 = vector.broadcast %c20_i32 : i32 to vector<8x1xi32>
    %50 = arith.cmpi slt, %48, %49 : vector<8x1xi32>
    %cst_15 = arith.constant 0.000000e+00 : f32
    %51 = vector.broadcast %cst_15 : f32 to vector<8x1xf32>
    %52 = arith.select %50, %44, %51 : vector<8x1xi1>, vector<8x1xf32>
    %53 = vector.shape_cast %52 : vector<8x1xf32> to vector<1x8x1xf32>
    %cst_16 = arith.constant dense<0.000000e+00> : vector<1xf32>
    %54 = vector.multi_reduction <add>, %53, %cst_16 [1, 2] : vector<1x8x1xf32> to vector<1xf32>
    %55 = vector.shape_cast %54 : vector<1xf32> to vector<1x1x1xf32>
    %56 = vector.extract %55[0, 0, 0] : f32 from vector<1x1x1xf32>
    %57 = vector.broadcast %56 : f32 to vector<1x128xf32>
    %c0_17 = arith.constant 0 : index
    %c0_18 = arith.constant 0 : index
    %58 = vector.load %arg3[%c0_17, %c0_18] : memref<1x128xf32, #tpu.memory_space<vmem>>, vector<1x128xf32>
    tpu.vector_store %arg3[%c0_17, %c0_18], %57 {strides = array<i32>} : memref<1x128xf32, #tpu.memory_space<vmem>>, vector<1x128xf32>,
    return
  }
  func.func @transform_0(%arg0: i32) -> (i32, i32) {
    %c0_i32 = arith.constant 0 : i32
    %c0_i32_0 = arith.constant 0 : i32
    return %arg0, %c0_i32 : i32, i32
  }
  func.func @transform_1(%arg0: i32) -> (i32, i32) {
    %c0_i32 = arith.constant 0 : i32
    %c0_i32_0 = arith.constant 0 : i32
    return %arg0, %c0_i32 : i32, i32
  }
  func.func @transform_2(%arg0: i32) -> (i32, i32) {
    %c0_i32 = arith.constant 0 : i32
    %c0_i32_0 = arith.constant 0 : i32
    return %c0_i32, %arg0 : i32, i32
  }
}

</mosaic_0001>

<bundles_post_ra>
// kernel: tpu_custom_call.1
= control target key start
LH: loop header
LB: loop body
LE: loop exit
PB: predicated region body
PF: predicated region fallthrough
CT: control target
= control target key end

     0   :  { %7 = vsyncpa [#allocation3], 0  ;;  %s561_s0 = inlined_call_operand.vmem [shape: f32[20,16], index: 0, kind: input, shape index: {}]   ;;  %s562_s1 = inlined_call_operand.vmem [shape: s32[20,1], index: 1, kind: input, shape index: {}]   ;;  %s563_s2 = inlined_call_operand.hbm [shape: f32[1,384], index: 2, kind: output, shape index: {}]  }
   0x1   :  { %9 = vsyncpa [#allocation3 + $0x1], 0  ;;  %s449_s9 = smov 0   ;;  %s451_s10 = smov 0  }
   0x2   :  { %s453_s11 = smov 0   ;;  %s455_s12 = smov 0  }
   0x3 LB: > { %s470_s13 = sadd.s32 4294967295, %s430_s12   ;;  %s311_s14 = sadd.s32 4294967294, %s430_s12   ;;  %s430_s12 = sphi %s455_s12, %s569_s12   ;;  %s426_s11 = sphi %s453_s11, %s568_s11   ;;  %s422_s10 = sphi %s451_s10, %s567_s10   ;;  %s418_s9 = sphi %s449_s9, %s566_s9  }
   0x4   : > { %s474_s15 = sadd.s32 1, %s430_s12   ;;  %s74_s16 = sadd.s32 1, %s426_s11 }
   0x5   : > { %s71_s17 = ssub.s32 %s430_s12, %s474_s15  ;;  %p84_p0 = scmp.ne.s32.totalorder %s426_s11, %s422_s10 }
   0x6   : > { %p72_p1 = scmp.eq.s32.totalorder %s71_s17, 0  ;;  %p85_p2 = scmp.eq.s32.totalorder %s470_s13, 2 }
   0x7   : > { %p90_p3 = scmp.ne.s32.totalorder %s422_s10, %s418_s9  ;;  %p91_p4 = scmp.eq.s32.totalorder %s311_s14, 2 }
   0x8   : > { %s485_s18 = scalar_select %p72_p1, %s426_s11, %s74_s16  }
   0x9   : > { %p487_p5 = por %p85_p2, %p84_p0  ;;  %p491_p6 = por %p91_p4, %p90_p3 }
   0xa   : > { %p314_p7 = scmp.ge.s32.totalorder %s430_s12, 1  ;;  %p123_p8 = scmp.lt.s32.totalorder %s430_s12, 4 }
   0xc   : > { %p124_p9 = pnand %p314_p7, %p123_p8 }
   0xd   : > { %p147_p10 = scmp.lt.s32.totalorder (!%p124_p9), %s470_s13, 2  ;;  %v432_v0 = vmov (!%p124_p9), 0   ;;  %vm164_vm0 = vcmask (!%p124_p9), 130048   ;;  %v157_v4 = vlaneseq (!%p124_p9)  ;;  %s317_s29 = sshll.u32 (!%p124_p9), %s470_s13, 3  ;;  %vm218_vm7 = vcmask (!%p124_p9), 7168  }
   0xe   : > { %127 = sbr.rel (%p124_p9) target bundleno = 840 (0x348), region = 28  ;;  %363 = vset.pattern.permute.xlu0 (!%p124_p9), %v432_v0  ;;  %v214_v35 = vstv (!%p124_p9), %s317_s29  ;;  %s145_s30 = sand.u32 (!%p124_p9), 1, %s422_s10  }
   0xf   : > { %v158_v5 = vand.u32 (!%p124_p9), 127, %v157_v4  ;;  %v213_v34 = vshrl.u32 (!%p124_p9), %v157_v4, 7  ;;  %s146_s3 = scalar_lea.vmem (!%p124_p9), [#allocation2], %s145_s30  ;;  %s318_s5 = sshll.u32 (!%p124_p9), %s470_s13, 4 }
  0x10   : > { %s244_s4 = sshll.u32 (!%p124_p9), %s146_s3, 4  ;;  %s521_s14 = scalar_lea.hbm (!%p124_p9), %s563_s2, %s318_s5  ;;  %s516_s4 = int_to_ptr.vmem [resolvable:$true] %s244_s4 }
  0x11   : > { %v215_v39 = vadd.s32 (!%p124_p9), %v214_v35, %v213_v34  ;;  %s232_s16 = scalar_lea.sflag (!%p124_p9), [#allocation3], %s145_s30  ;;  %s368_s17 = scalar_lea.vmem (!%p124_p9), %s516_s4, 16 }
  0x12   : > { %p369_p11 = scmp.ne.s32.totalorder (!%p124_p9), %s516_s4, %s368_s17 }
  0x13   : > { %vm216_vm6 = vcmp.lt.s32.totalorder (!%p124_p9), %v215_v39, 20 }
  0x14   : > { %p370_p12 = pnand (!%p124_p9), %p369_p11, %p487_p5 }
  0x15   : > { %s148_s21 = scalar_select %p147_p10, %s470_s13, 2 }
  0x16   : > { %p371_p13 = pneg %p370_p12  ;;  %s433_s13 = smov [#allocation2]  }
  0x17   : > { %s315_s22 = sshll.u32 %s148_s21, 3  ;;  %s372_s21 = sshll.u32 %s433_s13, 4  ;;  %s373_s21 = int_to_ptr.vmem [resolvable:$false] %s372_s21 }
  0x18   : > { %s150_s25 = scalar_lea.vmem %s561_s0, %s315_s22  ;;  %s154_s28 = scalar_lea.vmem %s562_s1, %s315_s22 }
  0x19   : > { %v155_v1 = vld [vmem:[%s150_s25] sm:$0xff]  ;;  %s374_s22 = scalar_lea.vmem %s373_s21, 32  ;;  %p375_p0 = scmp.lt.s32.totalorder %s516_s4, %s373_s21 }
  0x1a   : > { %v168_v2 = vsel %vm164_vm0, %v155_v1, -inf  ;;  %v156_v3 = vld [vmem:[%s154_s28] sm:$0xff]  ;;  %v195_v11 = vadd.f32 1.0, %v155_v1  ;;  %p376_p1 = scmp.lt.s32.totalorder %s374_s22, %s368_s17 }
  0x1b   : > { %169 = vmax.xlane.f32.xlu0 %v168_v2 }
  0x1c   : > { %p377_p2 = por %p376_p1, %p375_p0 }
  0x1e   : > { %p378_p3 = pnand %p377_p2, %p371_p13 }
  0x31   : > { %160 = vperm.xlu0 %363, %v156_v3  }
  0xa8   : > { %v170_v6 = vpop.xlane.xlu0 %169 }
  0xa9   : > { %vm171_vm1 = vcmp.eq.f32.partialorder %v155_v1, %v170_v6 }
  0xaa   : > { %v172_v7 = vsel %vm171_vm1, %v158_v5, 16 }
  0xab   : > { %v173_v8 = vsel %vm164_vm0, %v172_v7, 2147483647 }
  0xac   : > { %v175_v9 = vshra.s32 %v173_v8, 16  ;;  %v174_v15 = vand.u32 65535, %v173_v8 }
  0xae   : > { %v177_v10 = vcvt.s32.f32 %v175_v9  ;;  %v176_v17 = vcvt.s32.f32 %v174_v15 }
  0xb0   : > { %178 = vmin.xlane.f32.xlu1 %v177_v10  ;;  %v161_v12 = vpop.permute.xlu0 %160 }
  0xb1   : > { %vm162_vm2 = vcmp.eq.s32.totalorder %v158_v5, %v161_v12 }
  0xb2   : > { %v196_v13 = vsel %vm162_vm2, %v155_v1, %v195_v11  ;;  %v163_v31 = vsel %vm162_vm2, %v155_v1, 0.0 }
  0xb3   : > { %v197_v14 = vsel %vm164_vm0, %v196_v13, -inf  ;;  %v165_v32 = vsel %vm164_vm0, %v163_v31, 0.0 }
  0xb4   : > { %198 = vmax.xlane.f32.xlu1 %v197_v14 }
 0x13d   : > { %v179_v16 = vpop.xlane.xlu1 %178 }
 0x13e   : > { %vm180_vm3 = vcmp.eq.f32.partialorder %v177_v10, %v179_v16  ;;  %v185_v24 = vcvt.f32.s32 %v179_v16 }
 0x13f   : > { %v181_v18 = vsel %vm180_vm3, %v176_v17, inf }
 0x140   : > { %182 = vmin.xlane.f32.xlu1 %v181_v18  ;;  %v186_v26 = vshll.u32 %v185_v24, 16 }
 0x141   : > { %v199_v19 = vpop.xlane.xlu1 %198 }
 0x142   : > { %v201_v20 = vsub.f32 %v196_v13, %v199_v19 }
 0x144   : > { %v202_v21 = vmul.f32 1.442695, %v201_v20 }
 0x146   : > { %364 = vpow2.f32 %v202_v21 }
 0x150   : > { %v365_v22 = vpop.eup %364 }
 0x151   : > { %v204_v23 = vsel %vm164_vm0, %v365_v22, 0.0 }
 0x152   : > { %205 = vadd.xlane.f32.xlu1 %v204_v23 }
 0x1cd   : > { %v183_v25 = vpop.xlane.xlu1 %182 }
 0x1ce   : > { %v184_v27 = vcvt.f32.s32 %v183_v25 }
 0x1d0   : > { %v187_v28 = vadd.s32 %v186_v26, %v184_v27 }
 0x1d2   : > { %vm188_vm4 = vcmp.eq.s32.totalorder %v158_v5, %v187_v28 }
 0x1d3   : > { %v189_v29 = vsel %vm188_vm4, -inf, %v155_v1 }
 0x1d4   : > { %v190_v30 = vsel %vm164_vm0, %v189_v29, -inf }
 0x1d5   : > { %191 = vmax.xlane.f32.xlu1 %v190_v30 }
 0x1d9   : > { %166 = vadd.xlane.f32.xlu1 %v165_v32 }
 0x1df   : > { %v206_v33 = vpop.xlane.xlu1 %205 }
 0x1e0   : > { %366 = vlog2.f32 %v206_v33 }
 0x1ea   : > { %v367_v37 = vpop.eup %366 }
 0x1eb   : > { %v208_v40 = vmul.f32 0.6931472, %v367_v37 }
 0x262   : > { %v192_v36 = vpop.xlane.xlu1 %191 }
 0x263   : > { %v193_v38 = vsub.f32 %v170_v6, %v192_v36 }
 0x265   : > { %vm194_vm5 = vcmp.ge.f32.partialorder %v193_v38, 6.9077554 }
 0x266   : > { %v167_v41 = vpop.xlane.xlu1 %166  ;;  %v209_v43 = vsel %vm194_vm5, 0.0, %v208_v40 }
 0x267   : > { %v200_v42 = vsub.f32 %v199_v19, %v167_v41 }
 0x269   : > { %v210_v44 = vadd.f32 %v209_v43, %v200_v42 }
 0x26b   : > { %v217_v45 = vsel %vm216_vm6, %v210_v44, 0.0 }
 0x26c   : > { %v219_v46 = vsel %vm218_vm7, %v217_v45, 0.0 }
 0x26d   : > { %220 = vadd.xlane.f32.xlu1 %v219_v46 }
 0x2fa   : > { %v221_v47 = vpop.xlane.xlu1 %220 }
 0x2fb   : > { %v222_v48 = vrot.slane %v221_v47, 4 }
 0x2fd   : > { %v223_v49 = vadd.f32 %v222_v48, %v221_v47 }
 0x2ff   : > { %v224_v50 = vrot.slane %v223_v49, 2 }
 0x301   : > { %v225_v51 = vadd.f32 %v224_v50, %v223_v49 }
 0x303   : > { %v226_v52 = vrot.slane %v225_v51, 1 }
 0x305   : > { %v227_v53 = vadd.f32 %v226_v52, %v225_v51 }
 0x307   : > { %321 = vpush %v227_v53 }
 0x338   : > { %s322_s6 = spop %321 }
 0x339   : > { %v229_v54 = vstv %s322_s6 }
 0x33a   : > { %230 = vst [vmem:[%s146_s3] sm:$0x1] %v229_v54 }
 0x33b   : > { %381 = shalt.err (!%p378_p3)
}
 0x33c   : > { %s382_s23 = scalar_lea.hbm %s521_s14, 16  ;;  %s386_s26 = scalar_lea.hbm %s563_s2, 48 }
 0x33d   : > { %p383_p4 = scmp.ne.s32.totalorder %s521_s14, %s382_s23  ;;  %p387_p9 = scmp.lt.u32.totalorder %s521_s14, %s563_s2 }
 0x33e   : > { %p388_p10 = scmp.lt.u32.totalorder %s386_s26, %s382_s23  ;;  %p390_p12 = scmp.lt.u32.totalorder %s382_s23, %s521_s14 }
 0x33f   : > { %p384_p7 = pnand %p383_p4, %p487_p5 }
 0x340   : > { %p389_p11 = por %p388_p10, %p387_p9 }
 0x341   : > { %p385_p8 = pneg %p384_p7 }
 0x342   : > { %p391_p13 = por %p390_p12, %p389_p11 }
 0x344   : > { %p392_p0 = pnand %p391_p13, %p385_p8 }
 0x346   : > { %395 = shalt.err (!%p392_p0)
}
 0x347   : > { %323 = dma.vmem_to_hbm [thread:$0]  (%p487_p5), %s516_s4, 16, %s521_s14, %s232_s16  }
 0x348 PF: > { %p329_p1 = scmp.ge.s32.totalorder %s430_s12, 2  ;;  %s256_s29 = sand.u32 1, %s418_s9  }
 0x349   : > { %s257_s30 = scalar_lea.sflag [#allocation3], %s256_s29 }
 0x34a   : > { %p326_p2 = pnand %p329_p1, %p491_p6 }
 0x34c   : > { %413 = dma.done.wait (!%p326_p2), %s257_s30, 16  }
 0x34d   : > { %415 = vsyncadd (!%p326_p2), %s257_s30, 4294967280  ;;  %p12_p3 = scmp.ge.s32.totalorder %s474_s15, 5   ;;  %s566_s9 = smov %s422_s10 }
 0x34e   : > { %s567_s10 = smov %s426_s11  ;;  %s568_s11 = smov %s485_s18 }
 0x34f   : > { %s569_s12 = smov %s474_s15  ;;  %14 = sbr.rel (!%p12_p3) target bundleno = 3 (0x3), region = 66 }
 0x356   :  { %261 = vsyncpa [#allocation3], 1 }
 0x357   :  { %263 = vsyncpa [#allocation3 + $0x1], 1 }

</bundles_post_ra>
